<compile_context>
chip_gen: v5e
topology: v5e:2x2
jax: 0.10.0
libtpu: 0.0.40
codegen_flags: <defaults>
</compile_context>

<pallas_src>
import jax
import jax.numpy as jnp
from jax.experimental import pallas as pl
from jax.experimental.pallas import tpu as pltpu


def _cost_volume_kernel(left_ref, right_ref, out_ref):
    """left_ref/right_ref: (C, TH, W) VMEM tiles; out_ref: (2C, TH, W) = one disparity plane."""
    C, TH, W = left_ref.shape
    plane = pl.program_id(2)  # disparity plane index i (innermost grid axis)

    left = left_ref[...]
    right = right_ref[...]

    # Shared validity predicate: column w is valid for plane i iff w >= i.
    col = jax.lax.broadcasted_iota(jnp.int32, (TH, W), dimension=1)
    valid = col >= plane  # (TH, W), broadcasts over C at the selects below

    zeros = jnp.zeros_like(left)
    left_i = jnp.where(valid, left, zeros)

    # right shifted right by `plane` pixels along W (out[..., w] = right[..., w - i]);
    # the wrap-around columns (w < i) are zeroed by the same mask.
    right_rolled = pltpu.roll(right, shift=plane, axis=2)
    right_i = jnp.where(valid, right_rolled, zeros)

    out_ref[0:C, :, :] = left_i
    out_ref[C:, :, :] = right_i


def _pick_h_tile(H, cap=64):
    """Largest divisor of H that is a multiple of 8 and <= cap; else H itself."""
    if H <= cap:
        return H
    best = None
    for th in range(8, cap + 1, 8):
        if H % th == 0:
            best = th
    return best if best is not None else H


def build_concat_cost_volume(left, right, shift, downsample, *, h_tile=None):
    """Pallas entry point. left/right: (B, C, H, W). Returns (B, 2C, D, H, W)."""
    B, C, H, W = left.shape
    assert right.shape == left.shape
    D = shift // downsample
    assert D >= 1

    TH = _pick_h_tile(H) if h_tile is None else h_tile
    assert H % TH == 0, "H tile must divide H"

    # D is the innermost grid axis so left/right blocks (index_map independent of d)
    # stay resident in VMEM across all D planes of a given (b, h) tile.
    grid = (B, H // TH, D)

    return pl.pallas_call(
        _cost_volume_kernel,
        out_shape=jax.ShapeDtypeStruct((B, 2 * C, D, H, W), left.dtype),
        grid=grid,
        in_specs=[
            pl.BlockSpec((None, C, TH, W), lambda b, h, d: (b, 0, h, 0)),
            pl.BlockSpec((None, C, TH, W), lambda b, h, d: (b, 0, h, 0)),
        ],
        out_specs=pl.BlockSpec(
            (None, 2 * C, None, TH, W), lambda b, h, d: (b, 0, d, h, 0)
        ),
        compiler_params=pltpu.CompilerParams(
            dimension_semantics=("parallel", "parallel", "arbitrary"),
        ),
    )(left, right)


class BuildCostVolume:
    """JAX/Pallas equivalent of det3d BuildCostVolume (no learnable parameters)."""

    def __init__(self, volume_types=None):
        self.volume_types = volume_types or []

    def get_dim(self, feature_channel):
        d = 0
        for volume_type in self.volume_types:
            if volume_type["type"] == "concat":
                d += feature_channel * 2
            else:
                raise NotImplementedError
        return d

    def __call__(self, left, right, left_raw, right_raw, shift):
        volumes = []
        for volume_type in self.volume_types:
            if volume_type["type"] == "concat":
                downsample = volume_type["downsample"]
                volumes.append(build_concat_cost_volume(left, right, shift, downsample))
            else:
                raise NotImplementedError
        if len(volumes) > 1:
            return jnp.concatenate(volumes, axis=1)
        return volumes[0]


def _cost_volume_reference(left, right, shift, downsample):
    """Pure-JAX reference mirroring the PyTorch slice-assignment implementation."""
    B, C, H, W = left.shape
    D = shift // downsample
    vol = jnp.zeros((B, 2 * C, D, H, W), left.dtype)
    for i in range(D):
        if i == 0:
            vol = vol.at[:, :C, 0].set(left)
            vol = vol.at[:, C:, 0].set(right)
        else:
            vol = vol.at[:, :C, i, :, i:].set(left[:, :, :, i:])
            vol = vol.at[:, C:, i, :, i:].set(right[:, :, :, : W - i])
    return vol


if __name__ == "__main__":
    key = jax.random.PRNGKey(0)
    k1, k2, k3, k4 = jax.random.split(key, 4)

    B, C, H, W = 2, 8, 16, 128     # W multiple of 128 -> lane-dense, unmasked stores
    shift, downsample = 16, 4      # -> D = 4 disparity planes

    left = jax.random.normal(k1, (B, C, H, W), dtype=jnp.float32)
    right = jax.random.normal(k2, (B, C, H, W), dtype=jnp.float32)
    # raw images are unused by the 'concat' volume type (kept for interface parity)
    left_raw = jax.random.normal(k3, (B, 3, H, W), dtype=jnp.float32)
    right_raw = jax.random.normal(k4, (B, 3, H, W), dtype=jnp.float32)

    neck = BuildCostVolume(volume_types=[{"type": "concat", "downsample": downsample}])
    assert neck.get_dim(C) == 2 * C

    out = neck(left, right, left_raw, right_raw, shift)
    out = jax.block_until_ready(out)

    ref = _cost_volume_reference(left, right, shift, downsample)
    D = shift // downsample
    assert out.shape == (B, 2 * C, D, H, W)
    assert out.dtype == left.dtype
    assert jnp.array_equal(out, ref), "Pallas output mismatch vs reference"

    # Also exercise the multi-H-tile path (grid with H//TH > 1).
    out_tiled = jax.block_until_ready(
        build_concat_cost_volume(left, right, shift, downsample, h_tile=8)
    )
    assert jnp.array_equal(out_tiled, ref), "H-tiled Pallas output mismatch vs reference"

    print("KERNEL_OK")
</pallas_src>

<mosaic_0001>
module attributes {stable_mosaic.version = 11 : i64} {
  func.func @_cost_volume_kernel(%arg0: i32, %arg1: i32, %arg2: i32, %arg3: memref<1x8x16x128xf32, #tpu.memory_space<vmem>>, %arg4: memref<1x8x16x128xf32, #tpu.memory_space<vmem>>, %arg5: memref<1x16x1x16x128xf32, #tpu.memory_space<vmem>>) attributes {dimension_semantics = [#tpu.dimension_semantics<parallel>, #tpu.dimension_semantics<parallel>, #tpu.dimension_semantics<arbitrary>], iteration_bounds = array<i64: 2, 1, 4>, scalar_prefetch = 0 : i64, scratch_operands = 0 : i64, tpu.core_type = #tpu.core_type<tc>, window_params = [{transform_indices = @transform_0, window_bounds = array<i64: 1, 8, 16, 128>}, {transform_indices = @transform_1, window_bounds = array<i64: 1, 8, 16, 128>}, {transform_indices = @transform_2, window_bounds = array<i64: 1, 16, 1, 16, 128>}]} {
    %c0 = arith.constant 0 : index
    %c0_0 = arith.constant 0 : index
    %c0_1 = arith.constant 0 : index
    %c0_2 = arith.constant 0 : index
    %0 = vector.load %arg3[%c0, %c0_0, %c0_1, %c0_2] : memref<1x8x16x128xf32, #tpu.memory_space<vmem>>, vector<1x8x16x128xf32>
    %1 = vector.shape_cast %0 : vector<1x8x16x128xf32> to vector<8x16x128xf32>
    %c0_3 = arith.constant 0 : index
    %c0_4 = arith.constant 0 : index
    %c0_5 = arith.constant 0 : index
    %c0_6 = arith.constant 0 : index
    %2 = vector.load %arg4[%c0_3, %c0_4, %c0_5, %c0_6] : memref<1x8x16x128xf32, #tpu.memory_space<vmem>>, vector<1x8x16x128xf32>
    %3 = vector.shape_cast %2 : vector<1x8x16x128xf32> to vector<8x16x128xf32>
    %4 = tpu.iota {dimensions = array<i32: 1>} : vector<16x128xi32>
    %5 = vector.broadcast %arg2 : i32 to vector<16x128xi32>
    %6 = arith.cmpi sge, %4, %5 : vector<16x128xi32>
    %cst = arith.constant 0.000000e+00 : f32
    %7 = vector.broadcast %cst : f32 to vector<8x16x128xf32>
    %8 = vector.shape_cast %6 : vector<16x128xi1> to vector<1x16x128xi1>
    %9 = vector.broadcast %8 : vector<1x16x128xi1> to vector<8x16x128xi1>
    %10 = arith.select %9, %1, %7 : vector<8x16x128xi1>, vector<8x16x128xf32>
    %11 = tpu.dynamic_rotate %3 by %arg2 dim 2 : vector<8x16x128xf32>, i32 -> vector<8x16x128xf32>
    %12 = vector.shape_cast %6 : vector<16x128xi1> to vector<1x16x128xi1>
    %13 = vector.broadcast %12 : vector<1x16x128xi1> to vector<8x16x128xi1>
    %14 = arith.select %13, %11, %7 : vector<8x16x128xi1>, vector<8x16x128xf32>
    %c0_7 = arith.constant 0 : index
    %c0_8 = arith.constant 0 : index
    %c0_9 = arith.constant 0 : index
    %c0_10 = arith.constant 0 : index
    %c0_11 = arith.constant 0 : index
    %15 = vector.load %arg5[%c0_7, %c0_8, %c0_9, %c0_10, %c0_11] : memref<1x16x1x16x128xf32, #tpu.memory_space<vmem>>, vector<1x8x1x16x128xf32>
    %16 = vector.shape_cast %15 : vector<1x8x1x16x128xf32> to vector<8x16x128xf32>
    %17 = vector.shape_cast %10 : vector<8x16x128xf32> to vector<1x8x1x16x128xf32>
    tpu.vector_store %arg5[%c0_7, %c0_8, %c0_9, %c0_10, %c0_11], %17 {strides = array<i32>} : memref<1x16x1x16x128xf32, #tpu.memory_space<vmem>>, vector<1x8x1x16x128xf32>,
    %c0_12 = arith.constant 0 : index
    %c8 = arith.constant 8 : index
    %c0_13 = arith.constant 0 : index
    %c0_14 = arith.constant 0 : index
    %c0_15 = arith.constant 0 : index
    %18 = vector.load %arg5[%c0_12, %c8, %c0_13, %c0_14, %c0_15] : memref<1x16x1x16x128xf32, #tpu.memory_space<vmem>>, vector<1x8x1x16x128xf32>
    %19 = vector.shape_cast %18 : vector<1x8x1x16x128xf32> to vector<8x16x128xf32>
    %20 = vector.shape_cast %14 : vector<8x16x128xf32> to vector<1x8x1x16x128xf32>
    tpu.vector_store %arg5[%c0_12, %c8, %c0_13, %c0_14, %c0_15], %20 {strides = array<i32>} : memref<1x16x1x16x128xf32, #tpu.memory_space<vmem>>, vector<1x8x1x16x128xf32>,
    return
  }
  func.func @transform_0(%arg0: i32, %arg1: i32, %arg2: i32) -> (i32, i32, i32, i32) {
    %c0_i32 = arith.constant 0 : i32
    %c0_i32_0 = arith.constant 0 : i32
    %c0_i32_1 = arith.constant 0 : i32
    return %arg0, %c0_i32, %arg1, %c0_i32_0 : i32, i32, i32, i32
  }
  func.func @transform_1(%arg0: i32, %arg1: i32, %arg2: i32) -> (i32, i32, i32, i32) {
    %c0_i32 = arith.constant 0 : i32
    %c0_i32_0 = arith.constant 0 : i32
    %c0_i32_1 = arith.constant 0 : i32
    return %arg0, %c0_i32, %arg1, %c0_i32_0 : i32, i32, i32, i32
  }
  func.func @transform_2(%arg0: i32, %arg1: i32, %arg2: i32) -> (i32, i32, i32, i32, i32) {
    %c0_i32 = arith.constant 0 : i32
    %c0_i32_0 = arith.constant 0 : i32
    %c0_i32_1 = arith.constant 0 : i32
    return %arg0, %c0_i32, %arg2, %arg1, %c0_i32_0 : i32, i32, i32, i32, i32
  }
}

</mosaic_0001>

<bundles_post_ra>
// kernel: tpu_custom_call.1
= control target key start
LH: loop header
LB: loop body
LE: loop exit
PB: predicated region body
PF: predicated region fallthrough
CT: control target
= control target key end

     0   :  { %s1238_s0 = inlined_call_operand.hbm [shape: f32[2,8,16,128], index: 0, kind: input, shape index: {}]   ;;  %s1239_s1 = inlined_call_operand.hbm [shape: f32[2,8,16,128], index: 1, kind: input, shape index: {}]   ;;  %s1240_s2 = inlined_call_operand.hbm [shape: f32[2,16,4,16,128], index: 2, kind: output, shape index: {}]  }
   0x1   :  { %1246 = sst [smem:[#allocation19_spill]] %s1238_s0 }
   0x2   :  { %7 = vsyncpa [#allocation3], 0 }
   0x3   :  { %9 = vsyncpa [#allocation3 + $0x1], 0 }
   0x4   :  { %10 = vsyncpa [#allocation6], 0 }
   0x5   :  { %12 = vsyncpa [#allocation6 + $0x1], 0 }
   0x6   :  { %13 = vsyncpa [#allocation4], 0 }
   0x7   :  { %15 = vsyncpa [#allocation4 + $0x1], 0  ;;  %s885_s9 = smov 0   ;;  %s887_s10 = smov 0  }
   0x8   :  { %s889_s11 = smov 0   ;;  %s891_s12 = smov 0  }
   0x9   :  { %s893_s13 = smov 0   ;;  %s895_s14 = smov 0  }
   0xa   :  { %s897_s15 = smov 0   ;;  %s899_s16 = smov 0  }
   0xb   :  { %s901_s17 = smov 0   ;;  %s903_s18 = smov 0  }
   0xc   :  { %s905_s19 = smov 0  }
   0xd LB: > { %1247 = sst [smem:[#allocation13_spill]] %s839_s14  ;;  %s541_s20 = sadd.s32 4294967295, %s859_s19   ;;  %s859_s19 = sphi %s905_s19, %s21_s19   ;;  %s855_s18 = sphi %s903_s18, %s1266_s18   ;;  %s851_s17 = sphi %s901_s17, %s1265_s17   ;;  %s847_s16 = sphi %s899_s16, %s1264_s16   ;;  %s843_s15 = sphi %s897_s15, %s1263_s15   ;;  %s839_s14 = sphi %s895_s14, %s1262_s14   ;;  %s835_s13 = sphi %s893_s13, %s1271_s13   ;;  %s831_s12 = sphi %s891_s12, %s1270_s12   ;;  %s827_s11 = sphi %s889_s11, %s1269_s11   ;;  %s823_s10 = sphi %s887_s10, %s1268_s10   ;;  %s819_s9 = sphi %s885_s9, %s1267_s9  }
   0xe   : > { %1248 = sst [smem:[#allocation14_spill]] %s851_s17  ;;  %s542_s21 = sadd.s32 4294967294, %s859_s19  }
   0xf   : > { %1249 = sst [smem:[#allocation15_spill]] %s855_s18  ;;  %s33_s22 = sadd.s32 1, %s851_s17 }
  0x10   : > { %s40_s23 = sadd.s32 1, %s855_s18  ;;  %p34_p0 = scmp.ge.s32.totalorder %s33_s22, 4 }
  0x11   : > { %s49_s24 = sadd.s32 1, %s839_s14  ;;  %p56_p1 = scmp.ne.s32.totalorder %s839_s14, %s835_s13 }
  0x12   : > { %p57_p2 = scmp.eq.s32.totalorder %s859_s19, 0  ;;  %s1273_s22 = smov (%p34_p0, %s33_s22), 0 }
  0x13   : > { %1250 = sst [smem:[#allocation16_spill]] %s1273_s22  ;;  %s1275_s23 = smov (!%p34_p0, %s40_s23), %s855_s18 }
  0x14   : > { %p949_p3 = por %p57_p2, %p56_p1  ;;  %p62_p4 = scmp.ne.s32.totalorder %s835_s13, %s831_s12 }
  0x15   : > { %p42_p5 = scmp.ge.s32.totalorder %s1275_s23, 2  ;;  %p63_p6 = scmp.eq.s32.totalorder %s541_s20, 0 }
  0x16   : > { %s101_s26 = ssub.s32 %s851_s17, %s1273_s22  ;;  %s107_s27 = sadd.s32 1, %s827_s11 }
  0x17   : > { %s1277_s23 = smov (%p42_p5, %s1275_s23), 0  ;;  %p959_p7 = por %p63_p6, %p62_p4 }
  0x18   : > { %1252 = sst [smem:[#allocation17_spill]] %s1277_s23  ;;  %p117_p8 = scmp.ne.s32.totalorder %s827_s11, %s823_s10 }
  0x19   : > { %s44_s29 = ssub.s32 %s855_s18, %s1277_s23  ;;  %p118_p9 = scmp.eq.s32.totalorder %s541_s20, 7 }
  0x1a   : > { %p47_p10 = scmp.eq.s32.totalorder %s44_s29, 0  ;;  %s102_s30 = sor.u32 %s101_s26, %s44_s29 }
  0x1b   : > { %p105_p11 = scmp.eq.s32.totalorder %s102_s30, 0  ;;  %p967_p12 = por %p118_p9, %p117_p8 }
  0x1c   : > { %s972_s4 = scalar_select %p47_p10, %s839_s14, %s49_s24  }
  0x1d   : > { %s975_s5 = scalar_select %p105_p11, %s827_s11, %s107_s27  }
  0x1e   : > { %1255 = sst [smem:[#allocation18_spill]] %s972_s4  ;;  %p123_p13 = scmp.ne.s32.totalorder %s823_s10, %s819_s9 }
  0x1f   : > { %p124_p0 = scmp.eq.s32.totalorder %s542_s21, 7  ;;  %p602_p1 = scmp.lt.s32.totalorder %s859_s19, 8 }
  0x20   : > { %s985_s7 = sand.u32 1, %s839_s14   ;;  %s577_s12 = sshll.u32 %s855_s18, 7 }
  0x21   : > { %p980_p2 = por %p124_p0, %p123_p13  ;;  %s545_s8 = sshll.u32 %s985_s7, 7 }
  0x22   : > { %s1257_s0 = sld [smem:[#allocation19_spill]]  ;;  %s148_s27 = scalar_lea.vmem [#allocation2], %s545_s8 }
  0x23   : > { %s158_s29 = sshll.u32 %s148_s27, 4  ;;  %p994_p4 = pnand %p602_p1, %p949_p3  ;;  %s159_s29 = int_to_ptr.vmem [resolvable:$true] %s158_s29 }
  0x24   : > { %p551_p5 = scmp.ge.s32.totalorder %s859_s19, 1  ;;  %s145_s23 = scalar_lea.sflag [#allocation3], %s985_s7 }
  0x25   : > { %s861_s22 = smov 128   ;;  %s862_s18 = smov 8  }
  0x26   : > { %p190_p6 = scmp.lt.s32.totalorder %s859_s19, 9  ;;  %s172_s25 = scalar_lea.vmem [#allocation5], %s545_s8 }
  0x27   : > { %s169_s17 = scalar_lea.sflag [#allocation6], %s985_s7 }
  0x28   : > { %s155_s26 = scalar_lea.hbm %s1257_s0, %s577_s12  ;;  %p191_p8 = pnand %p551_p5, %p190_p6 }
  0x29   : > { %s156_s30 = sshll.u32 %s155_s26, 4  ;;  %s179_s26 = scalar_lea.hbm %s1239_s1, %s577_s12  ;;  %s157_s30 = int_to_ptr.hbm [resolvable:$true] %s156_s30 }
  0x2a   : > { %594 = dma.hbm_to_vmem [thread:$0]  (!%p994_p4), %s157_s30, 2048, %s159_s29, %s145_s23, %s861_s22, %s861_s22, %s862_s18  }
  0x2b   : > { %s180_s27 = sshll.u32 %s179_s26, 4  ;;  %s182_s0 = sshll.u32 %s172_s25, 4  ;;  %s181_s27 = int_to_ptr.hbm [resolvable:$true] %s180_s27  ;;  %s183_s0 = int_to_ptr.vmem [resolvable:$true] %s182_s0 }
  0x2c   : > { %597 = dma.hbm_to_vmem [thread:$0]  (!%p994_p4), %s181_s27, 2048, %s183_s0, %s169_s17, %s861_s22, %s861_s22, %s862_s18  }
  0x2d   : > { %194 = sbr.rel (%p191_p8) target bundleno = 222 (0xde), region = 28  ;;  %s196_s4 = sand.u32 (!%p191_p8), 1, %s835_s13  }
  0x2e   : > { %s552_s14 = sshll.u32 (!%p191_p8), %s196_s4, 7  ;;  %s197_s23 = scalar_lea.sflag (!%p191_p8), [#allocation3], %s196_s4 }
  0x2f   : > { %s1010_s29 = scalar_lea.vmem (!%p191_p8), [#allocation2], %s552_s14 }
  0x32   : > { %806 = dma.done.wait (%p959_p7), %s197_s23, 2048  }
  0x33   : > { %808 = vsyncadd (%p959_p7), %s197_s23, 4294965248  ;;  %s207_s8 = scalar_lea.sflag [#allocation6], %s196_s4  ;;  %s1016_s12 = scalar_lea.vmem [#allocation5], %s552_s14 }
  0x34   : > { %810 = dma.done.wait (%p959_p7), %s207_s8, 2048  }
  0x35   : > { %812 = vsyncadd (%p959_p7), %s207_s8, 4294965248  ;;  %s234_s0 = sand.u32 1, %s823_s10   ;;  %s1024_s17 = sand.u32 127, %s843_s15   ;;  %v256_v0 = vld [vmem:[%s1016_s12] sm:$0xff]  ;;  %v258_v1 = vld [vmem:[%s1016_s12 + $0x10] sm:$0xff]  ;;  %v272_v16 = vlaneseq  ;;  %v274_v18 = vstv %s843_s15 }
  0x36   : > { %296 = vrot.lane.b32.xlu0 %v256_v0, %s1024_s17  ;;  %300 = vrot.lane.b32.xlu1 %v258_v1, %s1024_s17  ;;  %v260_v2 = vld [vmem:[%s1016_s12 + $0x20] sm:$0xff]  ;;  %v257_v3 = vld [vmem:[%s1016_s12 + $0x8] sm:$0xff]  ;;  %s554_s14 = sshll.u32 %s234_s0, 8  ;;  %s378_s22 = scalar_lea.sflag [#allocation4], %s234_s0 }
  0x37   : > { %304 = vrot.lane.b32.xlu2 %v260_v2, %s1024_s17  ;;  %v259_v4 = vld [vmem:[%s1016_s12 + $0x18] sm:$0xff]  ;;  %v261_v5 = vld [vmem:[%s1016_s12 + $0x28] sm:$0xff]  ;;  %v262_v6 = vld [vmem:[%s1016_s12 + $0x30] sm:$0xff]  ;;  %v273_v17 = vand.u32 127, %v272_v16  ;;  %s1074_s18 = scalar_lea.vmem [#allocation7], %s554_s14 }
  0x38   : > { %v263_v7 = vld [vmem:[%s1016_s12 + $0x38] sm:$0xff]  ;;  %v264_v8 = vld [vmem:[%s1016_s12 + $0x40] sm:$0xff]  ;;  %v265_v9 = vld [vmem:[%s1016_s12 + $0x48] sm:$0xff] }
  0x39   : > { %v266_v10 = vld [vmem:[%s1016_s12 + $0x50] sm:$0xff]  ;;  %v267_v11 = vld [vmem:[%s1016_s12 + $0x58] sm:$0xff]  ;;  %v268_v12 = vld [vmem:[%s1016_s12 + $0x60] sm:$0xff]  ;;  %vm1061_vm0 = vcmp.ge.s32.totalorder %v273_v17, %v274_v18 }
  0x3a   : > { %v269_v13 = vld [vmem:[%s1016_s12 + $0x68] sm:$0xff]  ;;  %v270_v14 = vld [vmem:[%s1016_s12 + $0x70] sm:$0xff]  ;;  %v271_v15 = vld [vmem:[%s1016_s12 + $0x78] sm:$0xff] }
  0x3b   : > { %v240_v20 = vld [vmem:[%s1010_s29] sm:$0xff]  ;;  %v241_v21 = vld [vmem:[%s1010_s29 + $0x8] sm:$0xff]  ;;  %v242_v22 = vld [vmem:[%s1010_s29 + $0x10] sm:$0xff] }
  0x3c   : > { %v243_v23 = vld [vmem:[%s1010_s29 + $0x18] sm:$0xff]  ;;  %v278_v24 = vsel %vm1061_vm0, %v240_v20, 0.0  ;;  %v244_v25 = vld [vmem:[%s1010_s29 + $0x20] sm:$0xff]  ;;  %v279_v26 = vsel %vm1061_vm0, %v241_v21, 0.0  ;;  %v245_v27 = vld [vmem:[%s1010_s29 + $0x28] sm:$0xff]  ;;  %v280_v28 = vsel %vm1061_vm0, %v242_v22, 0.0 }
  0x3d   : > { %344 = vst [vmem:[%s1074_s18] sm:$0xff] %v278_v24  ;;  %v246_v29 = vld [vmem:[%s1010_s29 + $0x30] sm:$0xff]  ;;  %v281_v30 = vsel %vm1061_vm0, %v243_v23, 0.0  ;;  %v247_v31 = vld [vmem:[%s1010_s29 + $0x38] sm:$0xff]  ;;  %v282_v32 = vsel %vm1061_vm0, %v244_v25, 0.0  ;;  %v248_v33 = vld [vmem:[%s1010_s29 + $0x40] sm:$0xff]  ;;  %v283_v34 = vsel %vm1061_vm0, %v245_v27, 0.0 }
  0x3e   : > { %298 = vrot.lane.b32.xlu0 %v257_v3, %s1024_s17  ;;  %302 = vrot.lane.b32.xlu1 %v259_v4, %s1024_s17  ;;  %345 = vst [vmem:[%s1074_s18 + $0x8] sm:$0xff] %v279_v26  ;;  %v249_v35 = vld [vmem:[%s1010_s29 + $0x48] sm:$0xff]  ;;  %v284_v36 = vsel %vm1061_vm0, %v246_v29, 0.0  ;;  %v285_v38 = vsel %vm1061_vm0, %v247_v31, 0.0  ;;  %v286_v40 = vsel %vm1061_vm0, %v248_v33, 0.0 }
  0x3f   : > { %306 = vrot.lane.b32.xlu2 %v261_v5, %s1024_s17  ;;  %346 = vst [vmem:[%s1074_s18 + $0x10] sm:$0xff] %v280_v28  ;;  %v250_v37 = vld [vmem:[%s1010_s29 + $0x50] sm:$0xff]  ;;  %v251_v39 = vld [vmem:[%s1010_s29 + $0x58] sm:$0xff]  ;;  %v287_v42 = vsel %vm1061_vm0, %v249_v35, 0.0 }
  0x40   : > { %347 = vst [vmem:[%s1074_s18 + $0x18] sm:$0xff] %v281_v30  ;;  %v252_v41 = vld [vmem:[%s1010_s29 + $0x60] sm:$0xff]  ;;  %v253_v44 = vld [vmem:[%s1010_s29 + $0x68] sm:$0xff]  ;;  %v288_v45 = vsel %vm1061_vm0, %v250_v37, 0.0  ;;  %v254_v46 = vld [vmem:[%s1010_s29 + $0x70] sm:$0xff]  ;;  %v289_v47 = vsel %vm1061_vm0, %v251_v39, 0.0 }
  0x41   : > { %348 = vst [vmem:[%s1074_s18 + $0x20] sm:$0xff] %v282_v32  ;;  %v255_v48 = vld [vmem:[%s1010_s29 + $0x78] sm:$0xff]  ;;  %v290_v49 = vsel %vm1061_vm0, %v252_v41, 0.0  ;;  %v291_v50 = vsel %vm1061_vm0, %v253_v44, 0.0  ;;  %v292_v51 = vsel %vm1061_vm0, %v254_v46, 0.0 }
  0x42   : > { %349 = vst [vmem:[%s1074_s18 + $0x28] sm:$0xff] %v283_v34  ;;  %v293_v52 = vsel %vm1061_vm0, %v255_v48, 0.0 }
  0x43   : > { %350 = vst [vmem:[%s1074_s18 + $0x30] sm:$0xff] %v284_v36 }
  0x44   : > { %351 = vst [vmem:[%s1074_s18 + $0x38] sm:$0xff] %v285_v38 }
  0x45   : > { %352 = vst [vmem:[%s1074_s18 + $0x40] sm:$0xff] %v286_v40 }
  0x46   : > { %308 = vrot.lane.b32.xlu0 %v262_v6, %s1024_s17  ;;  %310 = vrot.lane.b32.xlu1 %v263_v7, %s1024_s17  ;;  %353 = vst [vmem:[%s1074_s18 + $0x48] sm:$0xff] %v287_v42 }
  0x47   : > { %312 = vrot.lane.b32.xlu2 %v264_v8, %s1024_s17  ;;  %354 = vst [vmem:[%s1074_s18 + $0x50] sm:$0xff] %v288_v45 }
  0x48   : > { %355 = vst [vmem:[%s1074_s18 + $0x58] sm:$0xff] %v289_v47 }
  0x49   : > { %356 = vst [vmem:[%s1074_s18 + $0x60] sm:$0xff] %v290_v49 }
  0x4a   : > { %357 = vst [vmem:[%s1074_s18 + $0x68] sm:$0xff] %v291_v50 }
  0x4b   : > { %358 = vst [vmem:[%s1074_s18 + $0x70] sm:$0xff] %v292_v51 }
  0x4c   : > { %359 = vst [vmem:[%s1074_s18 + $0x78] sm:$0xff] %v293_v52 }
  0x4e   : > { %314 = vrot.lane.b32.xlu0 %v265_v9, %s1024_s17  ;;  %316 = vrot.lane.b32.xlu1 %v266_v10, %s1024_s17 }
  0x4f   : > { %318 = vrot.lane.b32.xlu2 %v267_v11, %s1024_s17 }
  0x56   : > { %320 = vrot.lane.b32.xlu0 %v268_v12, %s1024_s17  ;;  %322 = vrot.lane.b32.xlu1 %v269_v13, %s1024_s17 }
  0x57   : > { %324 = vrot.lane.b32.xlu2 %v270_v14, %s1024_s17 }
  0x5e   : > { %326 = vrot.lane.b32.xlu0 %v271_v15, %s1024_s17 }
  0x91   : > { %v305_v43 = vpop.permute.xlu2 %304 }
  0x92   : > { %v332_v53 = vsel %vm1061_vm0, %v305_v43, 0.0 }
  0x93   : > { %559 = vst [vmem:[%s1074_s18 + $0xa0] sm:$0xff] %v332_v53 }
  0x99   : > { %v307_v54 = vpop.permute.xlu2 %306 }
  0x9a   : > { %v333_v55 = vsel %vm1061_vm0, %v307_v54, 0.0 }
  0x9b   : > { %560 = vst [vmem:[%s1074_s18 + $0xa8] sm:$0xff] %v333_v55 }
  0xa1   : > { %v313_v56 = vpop.permute.xlu2 %312 }
  0xa2   : > { %v336_v57 = vsel %vm1061_vm0, %v313_v56, 0.0 }
  0xa3   : > { %563 = vst [vmem:[%s1074_s18 + $0xc0] sm:$0xff] %v336_v57 }
  0xa8   : > { %v297_v58 = vpop.permute.xlu0 %296  ;;  %v301_v59 = vpop.permute.xlu1 %300 }
  0xa9   : > { %v328_v60 = vsel %vm1061_vm0, %v297_v58, 0.0  ;;  %v330_v61 = vsel %vm1061_vm0, %v301_v59, 0.0  ;;  %v319_v62 = vpop.permute.xlu2 %318 }
  0xaa   : > { %555 = vst [vmem:[%s1074_s18 + $0x80] sm:$0xff] %v328_v60  ;;  %v339_v63 = vsel %vm1061_vm0, %v319_v62, 0.0 }
  0xab   : > { %557 = vst [vmem:[%s1074_s18 + $0x90] sm:$0xff] %v330_v61 }
  0xac   : > { %566 = vst [vmem:[%s1074_s18 + $0xd8] sm:$0xff] %v339_v63 }
  0xb0   : > { %v299_v0 = vpop.permute.xlu0 %298  ;;  %v303_v1 = vpop.permute.xlu1 %302 }
  0xb1   : > { %v329_v2 = vsel %vm1061_vm0, %v299_v0, 0.0  ;;  %v331_v3 = vsel %vm1061_vm0, %v303_v1, 0.0  ;;  %v325_v4 = vpop.permute.xlu2 %324 }
  0xb2   : > { %556 = vst [vmem:[%s1074_s18 + $0x88] sm:$0xff] %v329_v2  ;;  %v342_v5 = vsel %vm1061_vm0, %v325_v4, 0.0 }
  0xb3   : > { %558 = vst [vmem:[%s1074_s18 + $0x98] sm:$0xff] %v331_v3 }
  0xb4   : > { %569 = vst [vmem:[%s1074_s18 + $0xf0] sm:$0xff] %v342_v5 }
  0xb8   : > { %v309_v6 = vpop.permute.xlu0 %308  ;;  %v311_v7 = vpop.permute.xlu1 %310 }
  0xb9   : > { %v334_v8 = vsel %vm1061_vm0, %v309_v6, 0.0  ;;  %v335_v9 = vsel %vm1061_vm0, %v311_v7, 0.0 }
  0xba   : > { %561 = vst [vmem:[%s1074_s18 + $0xb0] sm:$0xff] %v334_v8 }
  0xbb   : > { %562 = vst [vmem:[%s1074_s18 + $0xb8] sm:$0xff] %v335_v9 }
  0xc0   : > { %v315_v10 = vpop.permute.xlu0 %314  ;;  %v317_v11 = vpop.permute.xlu1 %316 }
  0xc1   : > { %v337_v12 = vsel %vm1061_vm0, %v315_v10, 0.0  ;;  %v338_v13 = vsel %vm1061_vm0, %v317_v11, 0.0 }
  0xc2   : > { %564 = vst [vmem:[%s1074_s18 + $0xc8] sm:$0xff] %v337_v12 }
  0xc3   : > { %565 = vst [vmem:[%s1074_s18 + $0xd0] sm:$0xff] %v338_v13 }
  0xc8   : > { %v321_v14 = vpop.permute.xlu0 %320  ;;  %v323_v15 = vpop.permute.xlu1 %322 }
  0xc9   : > { %v340_v16 = vsel %vm1061_vm0, %v321_v14, 0.0  ;;  %v341_v17 = vsel %vm1061_vm0, %v323_v15, 0.0 }
  0xca   : > { %567 = vst [vmem:[%s1074_s18 + $0xe0] sm:$0xff] %v340_v16 }
  0xcb   : > { %568 = vst [vmem:[%s1074_s18 + $0xe8] sm:$0xff] %v341_v17 }
  0xd0   : > { %v327_v18 = vpop.permute.xlu0 %326 }
  0xd1   : > { %v343_v20 = vsel %vm1061_vm0, %v327_v18, 0.0 }
  0xd2   : > { %570 = vst [vmem:[%s1074_s18 + $0xf8] sm:$0xff] %v343_v20 }
  0xd3   : > { %s572_s28 = sshll.u32 %s843_s15, 1  ;;  %s573_s4 = sshll.u32 %s847_s16, 7 }
  0xd4   : > { %s391_s7 = sadd.s32 %s573_s4, %s572_s28  ;;  %s404_s30 = sshll.u32 %s1074_s18, 4  ;;  %s405_s30 = int_to_ptr.vmem [resolvable:$true] %s404_s30 }
  0xd5   : > { %s574_s21 = sshll.u32 %s391_s7, 3  ;;  %s863_s25 = smov 256  }
  0xd6   : > { %s393_s26 = scalar_lea.hbm %s1240_s2, %s574_s21  ;;  %583 = sst [smem:[#allocation9]] (%p967_p12), %s863_s25 }
  0xd7   : > { %s406_s27 = sshll.u32 %s393_s26, 4  ;;  %s864_s23 = smov 1024   ;;  %s407_s27 = int_to_ptr.hbm [resolvable:$true] %s406_s27 }
  0xd8   : > { %584 = sst [smem:[#allocation9 + $0x1]] (%p967_p12), %s864_s23  ;;  %s865_s15 = smov 2  }
  0xd9   : > { %585 = sst [smem:[#allocation9 + $0x2]] (%p967_p12), %s865_s15  ;;  %s866_s16 = smov 128  }
  0xda   : > { %586 = sst [smem:[#allocation9 + $0x3]] (%p967_p12), %s866_s16  ;;  %s867_s29 = smov 8  }
  0xdb   : > { %587 = sst [smem:[#allocation9 + $0x4]] (%p967_p12), %s866_s16  ;;  %s868_s8 = smov [#allocation8]  }
  0xdc   : > { %588 = sst [smem:[#allocation9 + $0x5]] (%p967_p12), %s867_s29  ;;  %s869_s12 = smov 0  }
  0xdd   : > { %589 = dma.general (%p967_p12), %s405_s30, 4096, %s407_s27, %s378_s22, %s868_s8, [#allocation9], %s869_s12, 0  }
  0xde PF: > { %p603_p3 = scmp.ge.s32.totalorder %s859_s19, 2  ;;  %s434_s0 = sand.u32 1, %s819_s9  }
  0xdf   : > { %s435_s17 = scalar_lea.sflag [#allocation4], %s434_s0 }
  0xe0   : > { %p599_p7 = pnand %p603_p3, %p980_p2 }
  0xe2   : > { %p600_p9 = pneg %p599_p7 }
  0xe4   : > { %814 = dma.done.wait (%p600_p9), %s435_s17, 4096  }
  0xe5   : > { %816 = vsyncadd (%p600_p9), %s435_s17, 4294963200  ;;  %s21_s19 = sadd.s32 1, %s859_s19   ;;  %s1261_s3 = sld [smem:[#allocation13_spill]] }
  0xe6   : > { %p18_p10 = scmp.ge.s32.totalorder %s21_s19, 10   ;;  %s1262_s14 = sld [smem:[#allocation18_spill]] }
  0xe7   : > { %s1263_s15 = sld [smem:[#allocation14_spill]]  ;;  %s1267_s9 = smov %s823_s10 }
  0xe8   : > { %s1264_s16 = sld [smem:[#allocation15_spill]]  ;;  %s1268_s10 = smov %s827_s11 }
  0xe9   : > { %s1265_s17 = sld [smem:[#allocation16_spill]]  ;;  %s1269_s11 = smov %s975_s5 }
  0xea   : > { %s1266_s18 = sld [smem:[#allocation17_spill]]  ;;  %s1270_s12 = smov %s835_s13 }
  0xeb   : > { %s1271_s13 = smov %s1261_s3  ;;  %20 = sbr.rel (!%p18_p10) target bundleno = 13 (0xd), region = 92 }
  0xf0   :  { %441 = vsyncpa [#allocation3], 1 }
  0xf1   :  { %443 = vsyncpa [#allocation3 + $0x1], 1 }
  0xf2   :  { %444 = vsyncpa [#allocation6], 1 }
  0xf3   :  { %446 = vsyncpa [#allocation6 + $0x1], 1 }
  0xf4   :  { %447 = vsyncpa [#allocation4], 1 }
  0xf5   :  { %449 = vsyncpa [#allocation4 + $0x1], 1 }

</bundles_post_ra>
